<compile_context>
chip_gen: v6e
topology: v6e:2x2x1
jax: 0.10.0
libtpu: 0.0.40
codegen_flags: <defaults>
</compile_context>

<pallas_src>
import jax
import jax.numpy as jnp
from jax.experimental import pallas as pl
from jax.experimental.pallas import tpu as pltpu


# ----------------------------------------------------------------------------
# Fused Pallas kernel (all RNN layers + MLP head)
# ----------------------------------------------------------------------------
def _make_fused_kernel(num_layers, T, B):
    """Kernel signature:
       (x, [w_ih, w_hh, b] * num_layers, w1, b1, w2_pad, b2_pad, out, pre_scr, seq_scr)
    x   : (T*B, D_in)  time-major flattened input (row = t*B + b)
    out : (T*B, O_pad) lane-dense output slab
    """

    def kernel(*refs):
        x_ref = refs[0]
        layer_refs = refs[1:1 + 3 * num_layers]
        w1_ref, b1_ref, w2_ref, b2_ref = refs[1 + 3 * num_layers:5 + 3 * num_layers]
        o_ref = refs[5 + 3 * num_layers]
        pre_ref = refs[6 + 3 * num_layers]   # VMEM scratch (T*B, H): hoisted x @ W_ih + b
        seq_ref = refs[7 + 3 * num_layers]   # VMEM scratch (T*B, H): per-layer hidden seq

        for layer in range(num_layers):
            w_ih = layer_refs[3 * layer][...]        # (D_in, H)
            w_hh = layer_refs[3 * layer + 1][...]    # (H, H)
            bias = layer_refs[3 * layer + 2][...]    # (1, H)
            H = w_hh.shape[0]

            # Hoisted input projection for all timesteps at once -> VMEM scratch.
            src = x_ref[...] if layer == 0 else seq_ref[...]
            pre_ref[...] = jnp.dot(src, w_ih, preferred_element_type=jnp.float32) + bias

            # Serialized recurrence: only h @ W_hh remains per step.  h rides in vregs
            # as the fori_loop carry; each step's output is stored straight into the
            # sequence scratch with a sublane-aligned sliced store.
            def step(t, h, w_hh=w_hh):
                start = pl.multiple_of(t * B, B)
                p_t = pre_ref[pl.ds(start, B), :]
                h_new = jnp.tanh(
                    p_t + jnp.dot(h, w_hh, preferred_element_type=jnp.float32)
                )
                seq_ref[pl.ds(start, B), :] = h_new
                return h_new

            jax.lax.fori_loop(
                0, T, step, jnp.zeros((B, H), jnp.float32), unroll=True
            )

        # MLP head: fnn1 -> relu -> fnn2 over the whole sequence at once,
        # stored lane-dense (O padded to 128 in the wrapper).
        seq = seq_ref[...]
        hid = jnp.dot(seq, w1_ref[...], preferred_element_type=jnp.float32) + b1_ref[...]
        hid = jnp.maximum(hid, 0.0)
        y = jnp.dot(hid, w2_ref[...], preferred_element_type=jnp.float32) + b2_ref[...]
        o_ref[...] = y.astype(o_ref.dtype)

    return kernel


def _full_spec(shape):
    # Whole-array block, resident in VMEM for the single (grid-less) invocation.
    return pl.BlockSpec(tuple(shape), lambda: tuple(0 for _ in shape))


# ----------------------------------------------------------------------------
# Wrapper
# ----------------------------------------------------------------------------
@jax.jit
def rnn_model_forward(x, params):
    """x: (B, T, input_size), batch_first — same contract as the PyTorch module."""
    B, T, D = x.shape
    num_layers = len(params["rnn_layers"])
    H = params["rnn_layers"][0][1].shape[0]
    F = params["w1_t"].shape[1]
    O = params["w2_t"].shape[1]

    LANE = 128
    O_pad = ((O + LANE - 1) // LANE) * LANE

    # Pad batch to the f32 sublane tile (8) so per-timestep slices are aligned.
    B_pad = ((B + 7) // 8) * 8
    xp = x.astype(jnp.float32)
    if B_pad != B:
        xp = jnp.pad(xp, ((0, B_pad - B), (0, 0), (0, 0)))

    # Time-major flatten: row index = t * B_pad + b.
    x_flat = jnp.transpose(xp, (1, 0, 2)).reshape(T * B_pad, D)

    # Zero-pad the final Linear to a lane-dense output slab (unmasked stores).
    w2_pad = jnp.pad(params["w2_t"], ((0, 0), (0, O_pad - O)))
    b2_pad = jnp.pad(params["b2"], ((0, 0), (0, O_pad - O)))

    inputs = [x_flat]
    in_specs = [_full_spec(x_flat.shape)]
    for (w_ih_t, w_hh_t, b) in params["rnn_layers"]:
        inputs += [w_ih_t, w_hh_t, b]
        in_specs += [_full_spec(w_ih_t.shape), _full_spec(w_hh_t.shape), _full_spec(b.shape)]
    inputs += [params["w1_t"], params["b1"], w2_pad, b2_pad]
    in_specs += [
        _full_spec(params["w1_t"].shape),
        _full_spec(params["b1"].shape),
        _full_spec(w2_pad.shape),
        _full_spec(b2_pad.shape),
    ]

    # Advisory cost estimate so XLA schedules the surrounding ops sanely.
    flops = 0
    d_in = D
    for _ in range(num_layers):
        flops += 2 * T * B_pad * (d_in * H + H * H)
        d_in = H
    flops += 2 * T * B_pad * (H * F + F * O_pad)
    transcendentals = num_layers * T * B_pad * H
    bytes_accessed = sum(int(a.size) * 4 for a in inputs) + T * B_pad * O_pad * 4

    kernel = _make_fused_kernel(num_layers, T, B_pad)
    y_flat = pl.pallas_call(
        kernel,
        out_shape=jax.ShapeDtypeStruct((T * B_pad, O_pad), jnp.float32),
        in_specs=in_specs,
        out_specs=_full_spec((T * B_pad, O_pad)),
        scratch_shapes=[
            pltpu.VMEM((T * B_pad, H), jnp.float32),   # pre_ref
            pltpu.VMEM((T * B_pad, H), jnp.float32),   # seq_ref
        ],
        cost_estimate=pl.CostEstimate(
            flops=flops, transcendentals=transcendentals, bytes_accessed=bytes_accessed
        ),
    )(*inputs)

    # (T*B_pad, O_pad) -> (B, T, O), dropping batch and lane padding.
    return y_flat.reshape(T, B_pad, O_pad)[:, :B, :O].transpose(1, 0, 2)


# ----------------------------------------------------------------------------
# Pure-JAX reference (for correctness check)
# ----------------------------------------------------------------------------
def rnn_model_reference(x, params):
    B, T, _ = x.shape
    h_seq = x.astype(jnp.float32)
    for (w_ih_t, w_hh_t, b) in params["rnn_layers"]:
        H = w_hh_t.shape[0]
        h = jnp.zeros((B, H), jnp.float32)
        outs = []
        for t in range(T):
            h = jnp.tanh(h_seq[:, t, :] @ w_ih_t + h @ w_hh_t + b)
            outs.append(h)
        h_seq = jnp.stack(outs, axis=1)
    y = jnp.maximum(h_seq @ params["w1_t"] + params["b1"], 0.0)
    y = y @ params["w2_t"] + params["b2"]
    return y


# ----------------------------------------------------------------------------
# Deterministic parameter init (mirrors nn.RNN / nn.Linear shapes)
# ----------------------------------------------------------------------------
def init_params(key, input_size, hidden_size, num_layers, output_size):
    def uniform(k, shape, bound):
        return jax.random.uniform(k, shape, jnp.float32, -bound, bound)

    params = {"rnn_layers": []}
    bound_rnn = 1.0 / jnp.sqrt(hidden_size)
    for layer in range(num_layers):
        d_in = input_size if layer == 0 else hidden_size
        key, k1, k2, k3, k4 = jax.random.split(key, 5)
        w_ih = uniform(k1, (hidden_size, d_in), bound_rnn)   # PyTorch shape (H, D)
        w_hh = uniform(k2, (hidden_size, hidden_size), bound_rnn)
        b_ih = uniform(k3, (hidden_size,), bound_rnn)
        b_hh = uniform(k4, (hidden_size,), bound_rnn)
        # store transposed weights + combined bias for the kernel
        params["rnn_layers"].append(
            (w_ih.T, w_hh.T, (b_ih + b_hh).reshape(1, hidden_size))
        )
    key, k1, k2, k3, k4 = jax.random.split(key, 5)
    b1lim = 1.0 / jnp.sqrt(hidden_size)
    b2lim = 1.0 / jnp.sqrt(30.0)
    params["w1_t"] = uniform(k1, (hidden_size, 30), b1lim)
    params["b1"] = uniform(k2, (30,), b1lim).reshape(1, 30)
    params["w2_t"] = uniform(k3, (30, output_size), b2lim)
    params["b2"] = uniform(k4, (output_size,), b2lim).reshape(1, output_size)
    return params


if __name__ == "__main__":
    input_size, hidden_size, num_layers, output_size = 16, 32, 2, 4
    batch, seq = 2, 8

    key = jax.random.PRNGKey(0)
    key, kx = jax.random.split(key)
    x = jax.random.normal(kx, (batch, seq, input_size), jnp.float32)
    params = init_params(key, input_size, hidden_size, num_layers, output_size)

    out = rnn_model_forward(x, params)
    out = jax.block_until_ready(out)

    ref = rnn_model_reference(x, params)
    assert out.shape == (batch, seq, output_size), out.shape
    assert jnp.allclose(out, ref, atol=1e-5, rtol=1e-5), float(jnp.max(jnp.abs(out - ref)))

    print("KERNEL_OK")
</pallas_src>

<mosaic_0001>
module attributes {stable_mosaic.version = 11 : i64} {
  func.func @kernel(%arg0: memref<64x16xf32, #tpu.memory_space<vmem>>, %arg1: memref<16x32xf32, #tpu.memory_space<vmem>>, %arg2: memref<32x32xf32, #tpu.memory_space<vmem>>, %arg3: memref<1x32xf32, #tpu.memory_space<vmem>>, %arg4: memref<32x32xf32, #tpu.memory_space<vmem>>, %arg5: memref<32x32xf32, #tpu.memory_space<vmem>>, %arg6: memref<1x32xf32, #tpu.memory_space<vmem>>, %arg7: memref<32x30xf32, #tpu.memory_space<vmem>>, %arg8: memref<1x30xf32, #tpu.memory_space<vmem>>, %arg9: memref<30x128xf32, #tpu.memory_space<vmem>>, %arg10: memref<1x128xf32, #tpu.memory_space<vmem>>, %arg11: memref<64x128xf32, #tpu.memory_space<vmem>>, %arg12: memref<64x32xf32, #tpu.memory_space<vmem>>, %arg13: memref<64x32xf32, #tpu.memory_space<vmem>>) attributes {dimension_semantics = [], scalar_prefetch = 0 : i64, scratch_operands = 2 : i64, tpu.core_type = #tpu.core_type<tc>} {
    %c0 = arith.constant 0 : index
    %c0_0 = arith.constant 0 : index
    %0 = vector.load %arg1[%c0, %c0_0] : memref<16x32xf32, #tpu.memory_space<vmem>>, vector<16x32xf32>
    %c0_1 = arith.constant 0 : index
    %c0_2 = arith.constant 0 : index
    %1 = vector.load %arg2[%c0_1, %c0_2] : memref<32x32xf32, #tpu.memory_space<vmem>>, vector<32x32xf32>
    %c0_3 = arith.constant 0 : index
    %c0_4 = arith.constant 0 : index
    %2 = vector.load %arg3[%c0_3, %c0_4] : memref<1x32xf32, #tpu.memory_space<vmem>>, vector<1x32xf32>
    %c0_5 = arith.constant 0 : index
    %c0_6 = arith.constant 0 : index
    %3 = vector.load %arg0[%c0_5, %c0_6] : memref<64x16xf32, #tpu.memory_space<vmem>>, vector<64x16xf32>
    %cst = arith.constant dense<0.000000e+00> : vector<64x32xf32>
    %4 = tpu.matmul %3, %0, %cst {dimension_numbers = #tpu.dot_dimension_numbers<[1], [0], [0], [1], [0, 0, 1, 1], [], []>} : vector<64x16xf32>, vector<16x32xf32>, vector<64x32xf32> -> vector<64x32xf32>
    %5 = vector.broadcast %2 : vector<1x32xf32> to vector<64x32xf32>
    %6 = arith.addf %4, %5 : vector<64x32xf32>
    %c0_7 = arith.constant 0 : index
    %c0_8 = arith.constant 0 : index
    %7 = vector.load %arg12[%c0_7, %c0_8] : memref<64x32xf32, #tpu.memory_space<vmem>>, vector<64x32xf32>
    tpu.vector_store %arg12[%c0_7, %c0_8], %6 {strides = array<i32>} : memref<64x32xf32, #tpu.memory_space<vmem>>, vector<64x32xf32>,
    %cst_9 = arith.constant 0.000000e+00 : f32
    %8 = vector.broadcast %cst_9 : f32 to vector<8x32xf32>
    %c0_i32 = arith.constant 0 : i32
    %c8_i32 = arith.constant 8 : i32
    %9 = arith.muli %c0_i32, %c8_i32 : i32
    %10 = tpu.assume_multiple %9, 8 : i32
    %11 = arith.index_cast %10 : i32 to index
    %c0_10 = arith.constant 0 : index
    %12 = vector.load %arg12[%11, %c0_10] : memref<64x32xf32, #tpu.memory_space<vmem>>, vector<8x32xf32>
    %cst_11 = arith.constant dense<0.000000e+00> : vector<8x32xf32>
    %13 = tpu.matmul %8, %1, %cst_11 {dimension_numbers = #tpu.dot_dimension_numbers<[1], [0], [0], [1], [0, 0, 1, 1], [], []>} : vector<8x32xf32>, vector<32x32xf32>, vector<8x32xf32> -> vector<8x32xf32>
    %14 = arith.addf %12, %13 : vector<8x32xf32>
    %15 = math.tanh %14 : vector<8x32xf32>
    %16 = arith.index_cast %10 : i32 to index
    %c0_12 = arith.constant 0 : index
    %17 = vector.load %arg13[%16, %c0_12] : memref<64x32xf32, #tpu.memory_space<vmem>>, vector<8x32xf32>
    tpu.vector_store %arg13[%16, %c0_12], %15 {strides = array<i32>} : memref<64x32xf32, #tpu.memory_space<vmem>>, vector<8x32xf32>,
    %c1_i32 = arith.constant 1 : i32
    %c8_i32_13 = arith.constant 8 : i32
    %18 = arith.muli %c1_i32, %c8_i32_13 : i32
    %19 = tpu.assume_multiple %18, 8 : i32
    %20 = arith.index_cast %19 : i32 to index
    %c0_14 = arith.constant 0 : index
    %21 = vector.load %arg12[%20, %c0_14] : memref<64x32xf32, #tpu.memory_space<vmem>>, vector<8x32xf32>
    %cst_15 = arith.constant dense<0.000000e+00> : vector<8x32xf32>
    %22 = tpu.matmul %15, %1, %cst_15 {dimension_numbers = #tpu.dot_dimension_numbers<[1], [0], [0], [1], [0, 0, 1, 1], [], []>} : vector<8x32xf32>, vector<32x32xf32>, vector<8x32xf32> -> vector<8x32xf32>
    %23 = arith.addf %21, %22 : vector<8x32xf32>
    %24 = math.tanh %23 : vector<8x32xf32>
    %25 = arith.index_cast %19 : i32 to index
    %c0_16 = arith.constant 0 : index
    %26 = vector.load %arg13[%25, %c0_16] : memref<64x32xf32, #tpu.memory_space<vmem>>, vector<8x32xf32>
    tpu.vector_store %arg13[%25, %c0_16], %24 {strides = array<i32>} : memref<64x32xf32, #tpu.memory_space<vmem>>, vector<8x32xf32>,
    %c2_i32 = arith.constant 2 : i32
    %c8_i32_17 = arith.constant 8 : i32
    %27 = arith.muli %c2_i32, %c8_i32_17 : i32
    %28 = tpu.assume_multiple %27, 8 : i32
    %29 = arith.index_cast %28 : i32 to index
    %c0_18 = arith.constant 0 : index
    %30 = vector.load %arg12[%29, %c0_18] : memref<64x32xf32, #tpu.memory_space<vmem>>, vector<8x32xf32>
    %cst_19 = arith.constant dense<0.000000e+00> : vector<8x32xf32>
    %31 = tpu.matmul %24, %1, %cst_19 {dimension_numbers = #tpu.dot_dimension_numbers<[1], [0], [0], [1], [0, 0, 1, 1], [], []>} : vector<8x32xf32>, vector<32x32xf32>, vector<8x32xf32> -> vector<8x32xf32>
    %32 = arith.addf %30, %31 : vector<8x32xf32>
    %33 = math.tanh %32 : vector<8x32xf32>
    %34 = arith.index_cast %28 : i32 to index
    %c0_20 = arith.constant 0 : index
    %35 = vector.load %arg13[%34, %c0_20] : memref<64x32xf32, #tpu.memory_space<vmem>>, vector<8x32xf32>
    tpu.vector_store %arg13[%34, %c0_20], %33 {strides = array<i32>} : memref<64x32xf32, #tpu.memory_space<vmem>>, vector<8x32xf32>,
    %c3_i32 = arith.constant 3 : i32
    %c8_i32_21 = arith.constant 8 : i32
    %36 = arith.muli %c3_i32, %c8_i32_21 : i32
    %37 = tpu.assume_multiple %36, 8 : i32
    %38 = arith.index_cast %37 : i32 to index
    %c0_22 = arith.constant 0 : index
    %39 = vector.load %arg12[%38, %c0_22] : memref<64x32xf32, #tpu.memory_space<vmem>>, vector<8x32xf32>
    %cst_23 = arith.constant dense<0.000000e+00> : vector<8x32xf32>
    %40 = tpu.matmul %33, %1, %cst_23 {dimension_numbers = #tpu.dot_dimension_numbers<[1], [0], [0], [1], [0, 0, 1, 1], [], []>} : vector<8x32xf32>, vector<32x32xf32>, vector<8x32xf32> -> vector<8x32xf32>
    %41 = arith.addf %39, %40 : vector<8x32xf32>
    %42 = math.tanh %41 : vector<8x32xf32>
    %43 = arith.index_cast %37 : i32 to index
    %c0_24 = arith.constant 0 : index
    %44 = vector.load %arg13[%43, %c0_24] : memref<64x32xf32, #tpu.memory_space<vmem>>, vector<8x32xf32>
    tpu.vector_store %arg13[%43, %c0_24], %42 {strides = array<i32>} : memref<64x32xf32, #tpu.memory_space<vmem>>, vector<8x32xf32>,
    %c4_i32 = arith.constant 4 : i32
    %c8_i32_25 = arith.constant 8 : i32
    %45 = arith.muli %c4_i32, %c8_i32_25 : i32
    %46 = tpu.assume_multiple %45, 8 : i32
    %47 = arith.index_cast %46 : i32 to index
    %c0_26 = arith.constant 0 : index
    %48 = vector.load %arg12[%47, %c0_26] : memref<64x32xf32, #tpu.memory_space<vmem>>, vector<8x32xf32>
    %cst_27 = arith.constant dense<0.000000e+00> : vector<8x32xf32>
    %49 = tpu.matmul %42, %1, %cst_27 {dimension_numbers = #tpu.dot_dimension_numbers<[1], [0], [0], [1], [0, 0, 1, 1], [], []>} : vector<8x32xf32>, vector<32x32xf32>, vector<8x32xf32> -> vector<8x32xf32>
    %50 = arith.addf %48, %49 : vector<8x32xf32>
    %51 = math.tanh %50 : vector<8x32xf32>
    %52 = arith.index_cast %46 : i32 to index
    %c0_28 = arith.constant 0 : index
    %53 = vector.load %arg13[%52, %c0_28] : memref<64x32xf32, #tpu.memory_space<vmem>>, vector<8x32xf32>
    tpu.vector_store %arg13[%52, %c0_28], %51 {strides = array<i32>} : memref<64x32xf32, #tpu.memory_space<vmem>>, vector<8x32xf32>,
    %c5_i32 = arith.constant 5 : i32
    %c8_i32_29 = arith.constant 8 : i32
    %54 = arith.muli %c5_i32, %c8_i32_29 : i32
    %55 = tpu.assume_multiple %54, 8 : i32
    %56 = arith.index_cast %55 : i32 to index
    %c0_30 = arith.constant 0 : index
    %57 = vector.load %arg12[%56, %c0_30] : memref<64x32xf32, #tpu.memory_space<vmem>>, vector<8x32xf32>
    %cst_31 = arith.constant dense<0.000000e+00> : vector<8x32xf32>
    %58 = tpu.matmul %51, %1, %cst_31 {dimension_numbers = #tpu.dot_dimension_numbers<[1], [0], [0], [1], [0, 0, 1, 1], [], []>} : vector<8x32xf32>, vector<32x32xf32>, vector<8x32xf32> -> vector<8x32xf32>
    %59 = arith.addf %57, %58 : vector<8x32xf32>
    %60 = math.tanh %59 : vector<8x32xf32>
    %61 = arith.index_cast %55 : i32 to index
    %c0_32 = arith.constant 0 : index
    %62 = vector.load %arg13[%61, %c0_32] : memref<64x32xf32, #tpu.memory_space<vmem>>, vector<8x32xf32>
    tpu.vector_store %arg13[%61, %c0_32], %60 {strides = array<i32>} : memref<64x32xf32, #tpu.memory_space<vmem>>, vector<8x32xf32>,
    %c6_i32 = arith.constant 6 : i32
    %c8_i32_33 = arith.constant 8 : i32
    %63 = arith.muli %c6_i32, %c8_i32_33 : i32
    %64 = tpu.assume_multiple %63, 8 : i32
    %65 = arith.index_cast %64 : i32 to index
    %c0_34 = arith.constant 0 : index
    %66 = vector.load %arg12[%65, %c0_34] : memref<64x32xf32, #tpu.memory_space<vmem>>, vector<8x32xf32>
    %cst_35 = arith.constant dense<0.000000e+00> : vector<8x32xf32>
    %67 = tpu.matmul %60, %1, %cst_35 {dimension_numbers = #tpu.dot_dimension_numbers<[1], [0], [0], [1], [0, 0, 1, 1], [], []>} : vector<8x32xf32>, vector<32x32xf32>, vector<8x32xf32> -> vector<8x32xf32>
    %68 = arith.addf %66, %67 : vector<8x32xf32>
    %69 = math.tanh %68 : vector<8x32xf32>
    %70 = arith.index_cast %64 : i32 to index
    %c0_36 = arith.constant 0 : index
    %71 = vector.load %arg13[%70, %c0_36] : memref<64x32xf32, #tpu.memory_space<vmem>>, vector<8x32xf32>
    tpu.vector_store %arg13[%70, %c0_36], %69 {strides = array<i32>} : memref<64x32xf32, #tpu.memory_space<vmem>>, vector<8x32xf32>,
    %c7_i32 = arith.constant 7 : i32
    %c8_i32_37 = arith.constant 8 : i32
    %72 = arith.muli %c7_i32, %c8_i32_37 : i32
    %73 = tpu.assume_multiple %72, 8 : i32
    %74 = arith.index_cast %73 : i32 to index
    %c0_38 = arith.constant 0 : index
    %75 = vector.load %arg12[%74, %c0_38] : memref<64x32xf32, #tpu.memory_space<vmem>>, vector<8x32xf32>
    %cst_39 = arith.constant dense<0.000000e+00> : vector<8x32xf32>
    %76 = tpu.matmul %69, %1, %cst_39 {dimension_numbers = #tpu.dot_dimension_numbers<[1], [0], [0], [1], [0, 0, 1, 1], [], []>} : vector<8x32xf32>, vector<32x32xf32>, vector<8x32xf32> -> vector<8x32xf32>
    %77 = arith.addf %75, %76 : vector<8x32xf32>
    %78 = math.tanh %77 : vector<8x32xf32>
    %79 = arith.index_cast %73 : i32 to index
    %c0_40 = arith.constant 0 : index
    %80 = vector.load %arg13[%79, %c0_40] : memref<64x32xf32, #tpu.memory_space<vmem>>, vector<8x32xf32>
    tpu.vector_store %arg13[%79, %c0_40], %78 {strides = array<i32>} : memref<64x32xf32, #tpu.memory_space<vmem>>, vector<8x32xf32>,
    %c8_i32_41 = arith.constant 8 : i32
    %c0_42 = arith.constant 0 : index
    %c0_43 = arith.constant 0 : index
    %81 = vector.load %arg4[%c0_42, %c0_43] : memref<32x32xf32, #tpu.memory_space<vmem>>, vector<32x32xf32>
    %c0_44 = arith.constant 0 : index
    %c0_45 = arith.constant 0 : index
    %82 = vector.load %arg5[%c0_44, %c0_45] : memref<32x32xf32, #tpu.memory_space<vmem>>, vector<32x32xf32>
    %c0_46 = arith.constant 0 : index
    %c0_47 = arith.constant 0 : index
    %83 = vector.load %arg6[%c0_46, %c0_47] : memref<1x32xf32, #tpu.memory_space<vmem>>, vector<1x32xf32>
    %c0_48 = arith.constant 0 : index
    %c0_49 = arith.constant 0 : index
    %84 = vector.load %arg13[%c0_48, %c0_49] : memref<64x32xf32, #tpu.memory_space<vmem>>, vector<64x32xf32>
    %cst_50 = arith.constant dense<0.000000e+00> : vector<64x32xf32>
    %85 = tpu.matmul %84, %81, %cst_50 {dimension_numbers = #tpu.dot_dimension_numbers<[1], [0], [0], [1], [0, 0, 1, 1], [], []>} : vector<64x32xf32>, vector<32x32xf32>, vector<64x32xf32> -> vector<64x32xf32>
    %86 = vector.broadcast %83 : vector<1x32xf32> to vector<64x32xf32>
    %87 = arith.addf %85, %86 : vector<64x32xf32>
    %c0_51 = arith.constant 0 : index
    %c0_52 = arith.constant 0 : index
    %88 = vector.load %arg12[%c0_51, %c0_52] : memref<64x32xf32, #tpu.memory_space<vmem>>, vector<64x32xf32>
    tpu.vector_store %arg12[%c0_51, %c0_52], %87 {strides = array<i32>} : memref<64x32xf32, #tpu.memory_space<vmem>>, vector<64x32xf32>,
    %cst_53 = arith.constant 0.000000e+00 : f32
    %89 = vector.broadcast %cst_53 : f32 to vector<8x32xf32>
    %c0_i32_54 = arith.constant 0 : i32
    %c8_i32_55 = arith.constant 8 : i32
    %90 = arith.muli %c0_i32_54, %c8_i32_55 : i32
    %91 = tpu.assume_multiple %90, 8 : i32
    %92 = arith.index_cast %91 : i32 to index
    %c0_56 = arith.constant 0 : index
    %93 = vector.load %arg12[%92, %c0_56] : memref<64x32xf32, #tpu.memory_space<vmem>>, vector<8x32xf32>
    %cst_57 = arith.constant dense<0.000000e+00> : vector<8x32xf32>
    %94 = tpu.matmul %89, %82, %cst_57 {dimension_numbers = #tpu.dot_dimension_numbers<[1], [0], [0], [1], [0, 0, 1, 1], [], []>} : vector<8x32xf32>, vector<32x32xf32>, vector<8x32xf32> -> vector<8x32xf32>
    %95 = arith.addf %93, %94 : vector<8x32xf32>
    %96 = math.tanh %95 : vector<8x32xf32>
    %97 = arith.index_cast %91 : i32 to index
    %c0_58 = arith.constant 0 : index
    %98 = vector.load %arg13[%97, %c0_58] : memref<64x32xf32, #tpu.memory_space<vmem>>, vector<8x32xf32>
    tpu.vector_store %arg13[%97, %c0_58], %96 {strides = array<i32>} : memref<64x32xf32, #tpu.memory_space<vmem>>, vector<8x32xf32>,
    %c1_i32_59 = arith.constant 1 : i32
    %c8_i32_60 = arith.constant 8 : i32
    %99 = arith.muli %c1_i32_59, %c8_i32_60 : i32
    %100 = tpu.assume_multiple %99, 8 : i32
    %101 = arith.index_cast %100 : i32 to index
    %c0_61 = arith.constant 0 : index
    %102 = vector.load %arg12[%101, %c0_61] : memref<64x32xf32, #tpu.memory_space<vmem>>, vector<8x32xf32>
    %cst_62 = arith.constant dense<0.000000e+00> : vector<8x32xf32>
    %103 = tpu.matmul %96, %82, %cst_62 {dimension_numbers = #tpu.dot_dimension_numbers<[1], [0], [0], [1], [0, 0, 1, 1], [], []>} : vector<8x32xf32>, vector<32x32xf32>, vector<8x32xf32> -> vector<8x32xf32>
    %104 = arith.addf %102, %103 : vector<8x32xf32>
    %105 = math.tanh %104 : vector<8x32xf32>
    %106 = arith.index_cast %100 : i32 to index
    %c0_63 = arith.constant 0 : index
    %107 = vector.load %arg13[%106, %c0_63] : memref<64x32xf32, #tpu.memory_space<vmem>>, vector<8x32xf32>
    tpu.vector_store %arg13[%106, %c0_63], %105 {strides = array<i32>} : memref<64x32xf32, #tpu.memory_space<vmem>>, vector<8x32xf32>,
    %c2_i32_64 = arith.constant 2 : i32
    %c8_i32_65 = arith.constant 8 : i32
    %108 = arith.muli %c2_i32_64, %c8_i32_65 : i32
    %109 = tpu.assume_multiple %108, 8 : i32
    %110 = arith.index_cast %109 : i32 to index
    %c0_66 = arith.constant 0 : index
    %111 = vector.load %arg12[%110, %c0_66] : memref<64x32xf32, #tpu.memory_space<vmem>>, vector<8x32xf32>
    %cst_67 = arith.constant dense<0.000000e+00> : vector<8x32xf32>
    %112 = tpu.matmul %105, %82, %cst_67 {dimension_numbers = #tpu.dot_dimension_numbers<[1], [0], [0], [1], [0, 0, 1, 1], [], []>} : vector<8x32xf32>, vector<32x32xf32>, vector<8x32xf32> -> vector<8x32xf32>
    %113 = arith.addf %111, %112 : vector<8x32xf32>
    %114 = math.tanh %113 : vector<8x32xf32>
    %115 = arith.index_cast %109 : i32 to index
    %c0_68 = arith.constant 0 : index
    %116 = vector.load %arg13[%115, %c0_68] : memref<64x32xf32, #tpu.memory_space<vmem>>, vector<8x32xf32>
    tpu.vector_store %arg13[%115, %c0_68], %114 {strides = array<i32>} : memref<64x32xf32, #tpu.memory_space<vmem>>, vector<8x32xf32>,
    %c3_i32_69 = arith.constant 3 : i32
    %c8_i32_70 = arith.constant 8 : i32
    %117 = arith.muli %c3_i32_69, %c8_i32_70 : i32
    %118 = tpu.assume_multiple %117, 8 : i32
    %119 = arith.index_cast %118 : i32 to index
    %c0_71 = arith.constant 0 : index
    %120 = vector.load %arg12[%119, %c0_71] : memref<64x32xf32, #tpu.memory_space<vmem>>, vector<8x32xf32>
    %cst_72 = arith.constant dense<0.000000e+00> : vector<8x32xf32>
    %121 = tpu.matmul %114, %82, %cst_72 {dimension_numbers = #tpu.dot_dimension_numbers<[1], [0], [0], [1], [0, 0, 1, 1], [], []>} : vector<8x32xf32>, vector<32x32xf32>, vector<8x32xf32> -> vector<8x32xf32>
    %122 = arith.addf %120, %121 : vector<8x32xf32>
    %123 = math.tanh %122 : vector<8x32xf32>
    %124 = arith.index_cast %118 : i32 to index
    %c0_73 = arith.constant 0 : index
    %125 = vector.load %arg13[%124, %c0_73] : memref<64x32xf32, #tpu.memory_space<vmem>>, vector<8x32xf32>
    tpu.vector_store %arg13[%124, %c0_73], %123 {strides = array<i32>} : memref<64x32xf32, #tpu.memory_space<vmem>>, vector<8x32xf32>,
    %c4_i32_74 = arith.constant 4 : i32
    %c8_i32_75 = arith.constant 8 : i32
    %126 = arith.muli %c4_i32_74, %c8_i32_75 : i32
    %127 = tpu.assume_multiple %126, 8 : i32
    %128 = arith.index_cast %127 : i32 to index
    %c0_76 = arith.constant 0 : index
    %129 = vector.load %arg12[%128, %c0_76] : memref<64x32xf32, #tpu.memory_space<vmem>>, vector<8x32xf32>
    %cst_77 = arith.constant dense<0.000000e+00> : vector<8x32xf32>
    %130 = tpu.matmul %123, %82, %cst_77 {dimension_numbers = #tpu.dot_dimension_numbers<[1], [0], [0], [1], [0, 0, 1, 1], [], []>} : vector<8x32xf32>, vector<32x32xf32>, vector<8x32xf32> -> vector<8x32xf32>
    %131 = arith.addf %129, %130 : vector<8x32xf32>
    %132 = math.tanh %131 : vector<8x32xf32>
    %133 = arith.index_cast %127 : i32 to index
    %c0_78 = arith.constant 0 : index
    %134 = vector.load %arg13[%133, %c0_78] : memref<64x32xf32, #tpu.memory_space<vmem>>, vector<8x32xf32>
    tpu.vector_store %arg13[%133, %c0_78], %132 {strides = array<i32>} : memref<64x32xf32, #tpu.memory_space<vmem>>, vector<8x32xf32>,
    %c5_i32_79 = arith.constant 5 : i32
    %c8_i32_80 = arith.constant 8 : i32
    %135 = arith.muli %c5_i32_79, %c8_i32_80 : i32
    %136 = tpu.assume_multiple %135, 8 : i32
    %137 = arith.index_cast %136 : i32 to index
    %c0_81 = arith.constant 0 : index
    %138 = vector.load %arg12[%137, %c0_81] : memref<64x32xf32, #tpu.memory_space<vmem>>, vector<8x32xf32>
    %cst_82 = arith.constant dense<0.000000e+00> : vector<8x32xf32>
    %139 = tpu.matmul %132, %82, %cst_82 {dimension_numbers = #tpu.dot_dimension_numbers<[1], [0], [0], [1], [0, 0, 1, 1], [], []>} : vector<8x32xf32>, vector<32x32xf32>, vector<8x32xf32> -> vector<8x32xf32>
    %140 = arith.addf %138, %139 : vector<8x32xf32>
    %141 = math.tanh %140 : vector<8x32xf32>
    %142 = arith.index_cast %136 : i32 to index
    %c0_83 = arith.constant 0 : index
    %143 = vector.load %arg13[%142, %c0_83] : memref<64x32xf32, #tpu.memory_space<vmem>>, vector<8x32xf32>
    tpu.vector_store %arg13[%142, %c0_83], %141 {strides = array<i32>} : memref<64x32xf32, #tpu.memory_space<vmem>>, vector<8x32xf32>,
    %c6_i32_84 = arith.constant 6 : i32
    %c8_i32_85 = arith.constant 8 : i32
    %144 = arith.muli %c6_i32_84, %c8_i32_85 : i32
    %145 = tpu.assume_multiple %144, 8 : i32
    %146 = arith.index_cast %145 : i32 to index
    %c0_86 = arith.constant 0 : index
    %147 = vector.load %arg12[%146, %c0_86] : memref<64x32xf32, #tpu.memory_space<vmem>>, vector<8x32xf32>
    %cst_87 = arith.constant dense<0.000000e+00> : vector<8x32xf32>
    %148 = tpu.matmul %141, %82, %cst_87 {dimension_numbers = #tpu.dot_dimension_numbers<[1], [0], [0], [1], [0, 0, 1, 1], [], []>} : vector<8x32xf32>, vector<32x32xf32>, vector<8x32xf32> -> vector<8x32xf32>
    %149 = arith.addf %147, %148 : vector<8x32xf32>
    %150 = math.tanh %149 : vector<8x32xf32>
    %151 = arith.index_cast %145 : i32 to index
    %c0_88 = arith.constant 0 : index
    %152 = vector.load %arg13[%151, %c0_88] : memref<64x32xf32, #tpu.memory_space<vmem>>, vector<8x32xf32>
    tpu.vector_store %arg13[%151, %c0_88], %150 {strides = array<i32>} : memref<64x32xf32, #tpu.memory_space<vmem>>, vector<8x32xf32>,
    %c7_i32_89 = arith.constant 7 : i32
    %c8_i32_90 = arith.constant 8 : i32
    %153 = arith.muli %c7_i32_89, %c8_i32_90 : i32
    %154 = tpu.assume_multiple %153, 8 : i32
    %155 = arith.index_cast %154 : i32 to index
    %c0_91 = arith.constant 0 : index
    %156 = vector.load %arg12[%155, %c0_91] : memref<64x32xf32, #tpu.memory_space<vmem>>, vector<8x32xf32>
    %cst_92 = arith.constant dense<0.000000e+00> : vector<8x32xf32>
    %157 = tpu.matmul %150, %82, %cst_92 {dimension_numbers = #tpu.dot_dimension_numbers<[1], [0], [0], [1], [0, 0, 1, 1], [], []>} : vector<8x32xf32>, vector<32x32xf32>, vector<8x32xf32> -> vector<8x32xf32>
    %158 = arith.addf %156, %157 : vector<8x32xf32>
    %159 = math.tanh %158 : vector<8x32xf32>
    %160 = arith.index_cast %154 : i32 to index
    %c0_93 = arith.constant 0 : index
    %161 = vector.load %arg13[%160, %c0_93] : memref<64x32xf32, #tpu.memory_space<vmem>>, vector<8x32xf32>
    tpu.vector_store %arg13[%160, %c0_93], %159 {strides = array<i32>} : memref<64x32xf32, #tpu.memory_space<vmem>>, vector<8x32xf32>,
    %c8_i32_94 = arith.constant 8 : i32
    %c0_95 = arith.constant 0 : index
    %c0_96 = arith.constant 0 : index
    %162 = vector.load %arg13[%c0_95, %c0_96] : memref<64x32xf32, #tpu.memory_space<vmem>>, vector<64x32xf32>
    %c0_97 = arith.constant 0 : index
    %c0_98 = arith.constant 0 : index
    %163 = vector.load %arg7[%c0_97, %c0_98] : memref<32x30xf32, #tpu.memory_space<vmem>>, vector<32x30xf32>
    %cst_99 = arith.constant dense<0.000000e+00> : vector<64x30xf32>
    %164 = tpu.matmul %162, %163, %cst_99 {dimension_numbers = #tpu.dot_dimension_numbers<[1], [0], [0], [1], [0, 0, 1, 1], [], []>} : vector<64x32xf32>, vector<32x30xf32>, vector<64x30xf32> -> vector<64x30xf32>
    %c0_100 = arith.constant 0 : index
    %c0_101 = arith.constant 0 : index
    %165 = vector.load %arg8[%c0_100, %c0_101] : memref<1x30xf32, #tpu.memory_space<vmem>>, vector<1x30xf32>
    %166 = vector.broadcast %165 : vector<1x30xf32> to vector<64x30xf32>
    %167 = arith.addf %164, %166 : vector<64x30xf32>
    %cst_102 = arith.constant 0.000000e+00 : f32
    %168 = vector.broadcast %cst_102 : f32 to vector<64x30xf32>
    %169 = arith.maximumf %167, %168 : vector<64x30xf32>
    %c0_103 = arith.constant 0 : index
    %c0_104 = arith.constant 0 : index
    %170 = vector.load %arg9[%c0_103, %c0_104] : memref<30x128xf32, #tpu.memory_space<vmem>>, vector<30x128xf32>
    %cst_105 = arith.constant dense<0.000000e+00> : vector<64x128xf32>
    %171 = tpu.matmul %169, %170, %cst_105 {dimension_numbers = #tpu.dot_dimension_numbers<[1], [0], [0], [1], [0, 0, 1, 1], [], []>} : vector<64x30xf32>, vector<30x128xf32>, vector<64x128xf32> -> vector<64x128xf32>
    %c0_106 = arith.constant 0 : index
    %c0_107 = arith.constant 0 : index
    %172 = vector.load %arg10[%c0_106, %c0_107] : memref<1x128xf32, #tpu.memory_space<vmem>>, vector<1x128xf32>
    %173 = vector.broadcast %172 : vector<1x128xf32> to vector<64x128xf32>
    %174 = arith.addf %171, %173 : vector<64x128xf32>
    %c0_108 = arith.constant 0 : index
    %c0_109 = arith.constant 0 : index
    %175 = vector.load %arg11[%c0_108, %c0_109] : memref<64x128xf32, #tpu.memory_space<vmem>>, vector<64x128xf32>
    tpu.vector_store %arg11[%c0_108, %c0_109], %174 {strides = array<i32>} : memref<64x128xf32, #tpu.memory_space<vmem>>, vector<64x128xf32>,
    return
  }
}

</mosaic_0001>

<bundles_post_ra>
// kernel: rnn_model_forward.1
= control target key start
LH: loop header
LB: loop body
LE: loop exit
PB: predicated region body
PF: predicated region fallthrough
CT: control target
= control target key end

     0   :  { %vm59_vm0 = vcmask 130048   ;;  %v2377_v3 = vmov 0.0   ;;  %vm2378_vm1 = vmmov 0   ;;  %vm189_vm2 = vcmask 261120   ;;  %s2853_s1 = inlined_call_operand.vmem [shape: f32[16,32], index: 1, kind: input, shape index: {}]   ;;  %s2854_s0 = inlined_call_operand.vmem [shape: f32[64,16], index: 0, kind: input, shape index: {}]   ;;  %s2855_s2 = inlined_call_operand.vmem [shape: f32[32,32], index: 2, kind: input, shape index: {}]   ;;  %s2856_s3 = inlined_call_operand.vmem [shape: f32[1,32], index: 3, kind: input, shape index: {}]   ;;  %s2857_s4 = inlined_call_operand.vmem [shape: f32[32,32], index: 4, kind: input, shape index: {}]   ;;  %s2858_s5 = inlined_call_operand.vmem [shape: f32[32,32], index: 5, kind: input, shape index: {}]   ;;  %s2859_s6 = inlined_call_operand.vmem [shape: f32[1,32], index: 6, kind: input, shape index: {}]   ;;  %s2860_s7 = inlined_call_operand.vmem [shape: f32[32,30], index: 7, kind: input, shape index: {}]   ;;  %s2861_s9 = inlined_call_operand.vmem [shape: f32[30,128], index: 9, kind: input, shape index: {}]   ;;  %s2862_s8 = inlined_call_operand.vmem [shape: f32[1,30], index: 8, kind: input, shape index: {}]   ;;  %s2863_s10 = inlined_call_operand.vmem [shape: f32[1,128], index: 10, kind: input, shape index: {}]   ;;  %s2864_s11 = inlined_call_operand.vmem [shape: f32[64,128], index: 11, kind: output, shape index: {}]  }
   0x1   :  { %v39_v0 = vld [vmem:[%s2853_s1 + $0x8] sm:$0xff]  ;;  %v38_v1 = vld [vmem:[%s2853_s1] sm:$0xff]  ;;  %2107 = vmatprep.subr.mxu1 %v2377_v3  ;;  %2115 = vmatprep.mubr.msk.f32.mxu1 %vm2378_vm1, %v2377_v3  ;;  %v2455_v4 = vld [vmem:[%s2855_s2 + $0x18] sm:$0xff]  ;;  %vm1793_vm3 = vcmask 1045504   ;;  %vm1768_vm4 = vcmask 244736  }
   0x2   :  { %v45_v2 = vld [vmem:[%s2854_s0] sm:$0xff]  ;;  %2091 = vmatprep.subr.mxu0 %v39_v0  ;;  %v2460_v5 = vld [vmem:[%s2855_s2 + $0x10] sm:$0xff]  ;;  %v46_v6 = vld [vmem:[%s2854_s0 + $0x8] sm:$0xff]  ;;  %2108 = vmatpush3.msra.mxu1 %v2455_v4 }
   0x3   :  { %2095 = vmatprep.mubr.msk.f32.mxu0 %vm59_vm0, %v45_v2  ;;  %2092 = vmatpush3.msra.mxu0 %v39_v0  ;;  %v2470_v7 = vld [vmem:[%s2855_s2 + $0x8] sm:$0xff]  ;;  %v2478_v8 = vld [vmem:[%s2855_s2] sm:$0xff]  ;;  %v47_v19 = vld [vmem:[%s2854_s0 + $0x10] sm:$0xff] }
   0x4   :  { %2093 = vmatprep.subr.mxu0 %v38_v1  ;;  %2109 = vmatprep.subr.mxu1 %v2377_v3  ;;  %v2507_v9 = vld [vmem:[%s2856_s3] ss:$0 sm:$0xff]  ;;  %v48_v20 = vld [vmem:[%s2854_s0 + $0x18] sm:$0xff]  ;;  %v50_v22 = vld [vmem:[%s2854_s0 + $0x28] sm:$0xff] }
   0x5   :  { %2094 = vmatpush3.msra.mxu0 %v38_v1  ;;  %2110 = vmatpush3.msra.mxu1 %v2460_v5  ;;  %v49_v21 = vld [vmem:[%s2854_s0 + $0x20] sm:$0xff]  ;;  %v51_v23 = vld [vmem:[%s2854_s0 + $0x30] sm:$0xff]  ;;  %v52_v24 = vld [vmem:[%s2854_s0 + $0x38] sm:$0xff] }
   0x6   :  { %2096 = vmatmul.mubr.msk.f32.vlgmr.msra.gmra.mxu0 %vm59_vm0, %v46_v6  ;;  %2111 = vmatprep.subr.mxu1 %v2377_v3  ;;  %v831_v57 = vld [vmem:[%s2857_s4 + $0x18] sm:$0xff]  ;;  %v830_v63 = vld [vmem:[%s2857_s4 + $0x10] sm:$0xff]  ;;  %v829_v1 = vld [vmem:[%s2857_s4 + $0x8] sm:$0xff] }
   0x7   :  { %2112 = vmatpush3.msra.mxu1 %v2470_v7  ;;  %2129 = vmatprep.subr.mxu0 %v2377_v3  ;;  %v828_v2 = vld [vmem:[%s2857_s4] sm:$0xff] }
   0x8   :  { %2113 = vmatprep.subr.mxu1 %v2377_v3  ;;  %2130 = vmatpush3.msra.mxu0 %v2455_v4 }
   0x9   :  { %2114 = vmatpush3.msra.mxu1 %v2478_v8  ;;  %2131 = vmatprep.subr.mxu0 %v2377_v3 }
   0xa   :  { %2116 = vmatmul.mubr.f32.vlgmr.msra.gmra.mxu1 %v2377_v3  ;;  %2118 = vmatprep.subr.mxu1 %v2377_v3 }
   0xb   :  { %2119 = vmatpush3.msra.mxu1 %v2455_v4  ;;  %2126 = vmatprep.mubr.msk.f32.mxu1 %vm2378_vm1, %v2377_v3 }
   0xc   :  { %2120 = vmatprep.subr.mxu1 %v2377_v3  ;;  %2132 = vmatpush3.msra.mxu0 %v2460_v5 }
   0xd   :  { %2121 = vmatpush3.msra.mxu1 %v2460_v5  ;;  %2133 = vmatprep.subr.mxu0 %v2377_v3 }
   0xe   :  { %2122 = vmatprep.subr.mxu1 %v2377_v3  ;;  %2134 = vmatpush3.msra.mxu0 %v2470_v7 }
   0xf   :  { %2123 = vmatpush3.msra.mxu1 %v2470_v7  ;;  %2135 = vmatprep.subr.mxu0 %v2377_v3 }
  0x10   :  { %2124 = vmatprep.subr.mxu1 %v2377_v3  ;;  %2136 = vmatpush3.msra.mxu0 %v2478_v8 }
  0x11   :  { %2125 = vmatpush3.msra.mxu1 %v2478_v8  ;;  %2151 = vmatprep.subr.mxu0 %v2377_v3 }
  0x12   :  { %2140 = vmatprep.subr.mxu1 %v2377_v3  ;;  %2098 = vmatprep.mubr.msk.f32.mxu0 %vm59_vm0, %v47_v19 }
  0x13   :  { %2099 = vmatmul.mubr.msk.f32.gmra.mxu0 %vm59_vm0, %v48_v20 }
  0x14   :  { %2101 = vmatprep.mubr.msk.f32.mxu0 %vm59_vm0, %v49_v21 }
  0x17   :  { %2102 = vmatmul.mubr.msk.f32.gmra.mxu0 %vm59_vm0, %v50_v22 }
  0x18   :  { %2104 = vmatprep.mubr.msk.f32.mxu0 %vm59_vm0, %v51_v23 }
  0x1b   :  { %2105 = vmatmul.mubr.msk.f32.gmra.mxu0 %vm59_vm0, %v52_v24 }
  0x1c   :  { %2137 = vmatprep.mubr.msk.f32.mxu0 %vm2378_vm1, %v2377_v3 }
  0xc6   :  { %v2097_v10 = vpop.f32.mrf.mxu0 }
  0xc7   :  { %v156_v11 = vadd.f32 %v2097_v10, %v2507_v9  ;;  %v2640_v10 = vld [vmem:[%s2858_s5 + $0x10] sm:$0xff] }
  0xc8   :  { %v150_v12 = vpop.f32.mrf.mxu0 }
  0xc9   :  { %191 = vst.msk [vmem:[#allocation2 + $0x8] sm:$0xff] %vm189_vm2, %v156_v11  ;;  %v151_v13 = vadd.f32 %v2507_v9, %v150_v12  ;;  %v2647_v11 = vld [vmem:[%s2858_s5 + $0x8] sm:$0xff]  ;;  %v2654_v12 = vld [vmem:[%s2858_s5] sm:$0xff] }
  0xca   :  { %v268_v14 = vpop.f32.mrf.mxu1 }
  0xcb   :  { %190 = vst.msk [vmem:[#allocation2] sm:$0xff] %vm189_vm2, %v151_v13 }
  0xcc   :  { %v2117_v15 = vpop.f32.mrf.mxu1 }
  0xd0   :  { %v276_v25 = vld [vmem:[#allocation2 + $0x8] sm:$0xff] }
  0xd2   :  { %v198_v16 = vld [vmem:[#allocation2] sm:$0xff] }
  0xd3   :  { %v272_v17 = vadd.f32 %v268_v14, %v198_v16  ;;  %v2100_v30 = vpop.f32.mrf.mxu0 }
  0xd4   :  { %v166_v31 = vadd.f32 %v2100_v30, %v2507_v9 }
  0xd5   :  { %2345 = vtanh.f32 %v272_v17  ;;  %v160_v32 = vpop.f32.mrf.mxu0  ;;  %v2662_v17 = vld [vmem:[%s2859_s6] ss:$0 sm:$0xff] }
  0xd6   :  { %193 = vst.msk [vmem:[#allocation2 + $0x18] sm:$0xff] %vm189_vm2, %v166_v31  ;;  %v161_v33 = vadd.f32 %v2507_v9, %v160_v32 }
  0xd7   :  { %v2103_v34 = vpop.f32.mrf.mxu0 }
  0xd8   :  { %192 = vst.msk [vmem:[#allocation2 + $0x10] sm:$0xff] %vm189_vm2, %v161_v33  ;;  %v176_v35 = vadd.f32 %v2103_v34, %v2507_v9 }
  0xd9   :  { %v170_v36 = vpop.f32.mrf.mxu0 }
  0xda   :  { %195 = vst.msk [vmem:[#allocation2 + $0x28] sm:$0xff] %vm189_vm2, %v176_v35  ;;  %v171_v37 = vadd.f32 %v2507_v9, %v170_v36 }
  0xdb   :  { %v2106_v38 = vpop.f32.mrf.mxu0 }
  0xdc   :  { %194 = vst.msk [vmem:[#allocation2 + $0x20] sm:$0xff] %vm189_vm2, %v171_v37  ;;  %v186_v39 = vadd.f32 %v2106_v38, %v2507_v9 }
  0xdd   :  { %v180_v40 = vpop.f32.mrf.mxu0  ;;  %v434_v47 = vld [vmem:[#allocation2 + $0x18] sm:$0xff] }
  0xde   :  { %197 = vst.msk [vmem:[#allocation2 + $0x38] sm:$0xff] %vm189_vm2, %v186_v39  ;;  %v181_v41 = vadd.f32 %v2507_v9, %v180_v40  ;;  %v2634_v9 = vld [vmem:[%s2858_s5 + $0x18] sm:$0xff] }
  0xdf   :  { %v355_v42 = vld [vmem:[#allocation2 + $0x10] sm:$0xff] }
  0xe0   :  { %196 = vst.msk [vmem:[#allocation2 + $0x30] sm:$0xff] %vm189_vm2, %v181_v41 }
  0xe1   :  { %v592_v58 = vld [vmem:[#allocation2 + $0x28] sm:$0xff] }
  0xe2   :  { %v2346_v18 = vpop.eup %2345 }
  0xe3   :  { %274 = vst.msk [vmem:[#allocation3] sm:$0xff] %vm189_vm2, %v2346_v18  ;;  %2127 = vmatmul.mubr.msk.f32.vlgmr.msra.gmra.mxu1 %vm189_vm2, %v2346_v18  ;;  %v513_v52 = vld [vmem:[#allocation2 + $0x20] sm:$0xff] }
  0xe4   :  { %2141 = vmatpush3.msra.mxu1 %v2455_v4  ;;  %2148 = vmatprep.mubr.msk.f32.mxu1 %vm2378_vm1, %v2377_v3 }
  0xe5   :  { %2142 = vmatprep.subr.mxu1 %v2377_v3  ;;  %v750_v32 = vld [vmem:[#allocation2 + $0x38] sm:$0xff] }
  0xe6   :  { %2143 = vmatpush3.msra.mxu1 %v2460_v5 }
  0xe7   :  { %2144 = vmatprep.subr.mxu1 %v2377_v3  ;;  %v671_v13 = vld [vmem:[#allocation2 + $0x30] sm:$0xff] }
  0xe8   :  { %2145 = vmatpush3.msra.mxu1 %v2470_v7 }
  0xe9   :  { %2146 = vmatprep.subr.mxu1 %v2377_v3 }
  0xea   :  { %2147 = vmatpush3.msra.mxu1 %v2478_v8  ;;  %v837_v0 = vld [vmem:[#allocation3] sm:$0xff] }
  0xeb   :  { %2162 = vmatprep.subr.mxu1 %v2377_v3 }
 0x1a3   :  { %v346_v26 = vpop.f32.mrf.mxu1 }
 0x1a4   :  { %v350_v27 = vadd.f32 %v346_v26, %v276_v25 }
 0x1a5   :  { %v2128_v28 = vpop.f32.mrf.mxu1 }
 0x1a6   :  { %2347 = vtanh.f32 %v350_v27 }
 0x1b3   :  { %v2348_v29 = vpop.eup %2347 }
 0x1b4   :  { %353 = vst.msk [vmem:[#allocation3 + $0x8] sm:$0xff] %vm189_vm2, %v2348_v29  ;;  %2138 = vmatmul.mubr.msk.f32.vlgmr.msra.gmra.mxu0 %vm189_vm2, %v2348_v29 }
 0x1b5   :  { %2152 = vmatpush3.msra.mxu0 %v2455_v4  ;;  %2159 = vmatprep.mubr.msk.f32.mxu0 %vm2378_vm1, %v2377_v3 }
 0x1b6   :  { %2153 = vmatprep.subr.mxu0 %v2377_v3 }
 0x1b7   :  { %2154 = vmatpush3.msra.mxu0 %v2460_v5 }
 0x1b8   :  { %2155 = vmatprep.subr.mxu0 %v2377_v3 }
 0x1b9   :  { %2156 = vmatpush3.msra.mxu0 %v2470_v7 }
 0x1ba   :  { %2157 = vmatprep.subr.mxu0 %v2377_v3 }
 0x1bb   :  { %2158 = vmatpush3.msra.mxu0 %v2478_v8 }
 0x1bc   :  { %2173 = vmatprep.subr.mxu0 %v2377_v3 }
 0x274   :  { %v425_v43 = vpop.f32.mrf.mxu0 }
 0x275   :  { %v429_v44 = vadd.f32 %v425_v43, %v355_v42 }
 0x276   :  { %v2139_v45 = vpop.f32.mrf.mxu0 }
 0x277   :  { %2349 = vtanh.f32 %v429_v44 }
 0x284   :  { %v2350_v46 = vpop.eup %2349 }
 0x285   :  { %432 = vst.msk [vmem:[#allocation3 + $0x10] sm:$0xff] %vm189_vm2, %v2350_v46  ;;  %2149 = vmatmul.mubr.msk.f32.vlgmr.msra.gmra.mxu1 %vm189_vm2, %v2350_v46 }
 0x286   :  { %2163 = vmatpush3.msra.mxu1 %v2455_v4  ;;  %2170 = vmatprep.mubr.msk.f32.mxu1 %vm2378_vm1, %v2377_v3 }
 0x287   :  { %2164 = vmatprep.subr.mxu1 %v2377_v3 }
 0x288   :  { %2165 = vmatpush3.msra.mxu1 %v2460_v5 }
 0x289   :  { %2166 = vmatprep.subr.mxu1 %v2377_v3 }
 0x28a   :  { %2167 = vmatpush3.msra.mxu1 %v2470_v7 }
 0x28b   :  { %2168 = vmatprep.subr.mxu1 %v2377_v3 }
 0x28c   :  { %2169 = vmatpush3.msra.mxu1 %v2478_v8 }
 0x28d   :  { %2184 = vmatprep.subr.mxu1 %v2377_v3 }
 0x345   :  { %v504_v48 = vpop.f32.mrf.mxu1 }
 0x346   :  { %v508_v49 = vadd.f32 %v504_v48, %v434_v47 }
 0x347   :  { %v2150_v50 = vpop.f32.mrf.mxu1 }
 0x348   :  { %2351 = vtanh.f32 %v508_v49 }
 0x355   :  { %v2352_v51 = vpop.eup %2351 }
 0x356   :  { %511 = vst.msk [vmem:[#allocation3 + $0x18] sm:$0xff] %vm189_vm2, %v2352_v51  ;;  %2160 = vmatmul.mubr.msk.f32.vlgmr.msra.gmra.mxu0 %vm189_vm2, %v2352_v51 }
 0x357   :  { %2174 = vmatpush3.msra.mxu0 %v2455_v4  ;;  %2181 = vmatprep.mubr.msk.f32.mxu0 %vm2378_vm1, %v2377_v3 }
 0x358   :  { %2175 = vmatprep.subr.mxu0 %v2377_v3 }
 0x359   :  { %2176 = vmatpush3.msra.mxu0 %v2460_v5 }
 0x35a   :  { %2177 = vmatprep.subr.mxu0 %v2377_v3 }
 0x35b   :  { %2178 = vmatpush3.msra.mxu0 %v2470_v7 }
 0x35c   :  { %2179 = vmatprep.subr.mxu0 %v2377_v3 }
 0x35d   :  { %2180 = vmatpush3.msra.mxu0 %v2478_v8  ;;  %v840_v6 = vld [vmem:[#allocation3 + $0x18] sm:$0xff] }
 0x35e   :  { %2195 = vmatprep.subr.mxu0 %v831_v57 }
 0x416   :  { %v583_v53 = vpop.f32.mrf.mxu0 }
 0x417   :  { %v587_v54 = vadd.f32 %v583_v53, %v513_v52 }
 0x418   :  { %v2161_v55 = vpop.f32.mrf.mxu0 }
 0x419   :  { %2353 = vtanh.f32 %v587_v54 }
 0x426   :  { %v2354_v56 = vpop.eup %2353 }
 0x427   :  { %590 = vst.msk [vmem:[#allocation3 + $0x20] sm:$0xff] %vm189_vm2, %v2354_v56  ;;  %2171 = vmatmul.mubr.msk.f32.vlgmr.msra.gmra.mxu1 %vm189_vm2, %v2354_v56 }
 0x428   :  { %2185 = vmatpush3.msra.mxu1 %v2455_v4  ;;  %2192 = vmatprep.mubr.msk.f32.mxu1 %vm2378_vm1, %v2377_v3  ;;  %v838_v4 = vld [vmem:[#allocation3 + $0x8] sm:$0xff] }
 0x429   :  { %2186 = vmatprep.subr.mxu1 %v2377_v3 }
 0x42a   :  { %2187 = vmatpush3.msra.mxu1 %v2460_v5  ;;  %v839_v5 = vld [vmem:[#allocation3 + $0x10] sm:$0xff] }
 0x42b   :  { %2188 = vmatprep.subr.mxu1 %v2377_v3 }
 0x42c   :  { %2189 = vmatpush3.msra.mxu1 %v2470_v7 }
 0x42d   :  { %2190 = vmatprep.subr.mxu1 %v2377_v3 }
 0x42e   :  { %2191 = vmatpush3.msra.mxu1 %v2478_v8  ;;  %v841_v7 = vld [vmem:[#allocation3 + $0x20] sm:$0xff] }
 0x42f   :  { %2215 = vmatprep.subr.mxu1 %v2377_v3 }
 0x4e7   :  { %v662_v59 = vpop.f32.mrf.mxu1 }
 0x4e8   :  { %v666_v60 = vadd.f32 %v662_v59, %v592_v58 }
 0x4e9   :  { %v2172_v61 = vpop.f32.mrf.mxu1 }
 0x4ea   :  { %2355 = vtanh.f32 %v666_v60 }
 0x4f7   :  { %v2356_v62 = vpop.eup %2355 }
 0x4f8   :  { %669 = vst.msk [vmem:[#allocation3 + $0x28] sm:$0xff] %vm189_vm2, %v2356_v62  ;;  %2182 = vmatmul.mubr.msk.f32.vlgmr.msra.gmra.mxu0 %vm189_vm2, %v2356_v62 }
 0x4f9   :  { %2196 = vmatpush3.msra.mxu0 %v831_v57  ;;  %2203 = vmatprep.mubr.msk.f32.mxu0 %vm189_vm2, %v837_v0 }
 0x4fa   :  { %2197 = vmatprep.subr.mxu0 %v830_v63 }
 0x4fb   :  { %2198 = vmatpush3.msra.mxu0 %v830_v63 }
 0x4fc   :  { %2199 = vmatprep.subr.mxu0 %v829_v1 }
 0x4fd   :  { %2200 = vmatpush3.msra.mxu0 %v829_v1 }
 0x4fe   :  { %2201 = vmatprep.subr.mxu0 %v828_v2 }
 0x4ff   :  { %2202 = vmatpush3.msra.mxu0 %v828_v2  ;;  %v842_v8 = vld [vmem:[#allocation3 + $0x28] sm:$0xff] }
 0x500   :  { %2204 = vmatmul.mubr.msk.f32.vlgmr.msra.gmra.mxu0 %vm189_vm2, %v838_v4  ;;  %2237 = vmatprep.subr.mxu0 %v2377_v3  ;;  %v1612_v4 = vld [vmem:[%s2860_s7 + $0x18] sm:$0xff] }
 0x501   :  { %2206 = vmatprep.mubr.msk.f32.mxu0 %vm189_vm2, %v839_v5  ;;  %2238 = vmatpush3.msra.mxu0 %v2634_v9 }
 0x502   :  { %2239 = vmatprep.subr.mxu0 %v2377_v3 }
 0x503   :  { %2240 = vmatpush3.msra.mxu0 %v2640_v10 }
 0x504   :  { %2207 = vmatmul.mubr.msk.f32.gmra.mxu0 %vm189_vm2, %v840_v6  ;;  %2241 = vmatprep.subr.mxu0 %v2377_v3 }
 0x505   :  { %2209 = vmatprep.mubr.msk.f32.mxu0 %vm189_vm2, %v841_v7  ;;  %2242 = vmatpush3.msra.mxu0 %v2647_v11 }
 0x506   :  { %2243 = vmatprep.subr.mxu0 %v2377_v3 }
 0x507   :  { %2244 = vmatpush3.msra.mxu0 %v2654_v12 }
 0x508   :  { %2210 = vmatmul.mubr.msk.f32.gmra.mxu0 %vm189_vm2, %v842_v8  ;;  %2259 = vmatprep.subr.mxu0 %v2377_v3 }
 0x5b8   :  { %v741_v14 = vpop.f32.mrf.mxu0 }
 0x5b9   :  { %v745_v15 = vadd.f32 %v741_v14, %v671_v13 }
 0x5ba   :  { %v2183_v16 = vpop.f32.mrf.mxu0 }
 0x5bb   :  { %2357 = vtanh.f32 %v745_v15 }
 0x5c0   :  { %v2205_v18 = vpop.f32.mrf.mxu0 }
 0x5c1   :  { %v947_v19 = vadd.f32 %v2205_v18, %v2662_v17  ;;  %v1760_v18 = vld [vmem:[%s2861_s9 + $0x18] sm:$0x3f] }
 0x5c2   :  { %v941_v20 = vpop.f32.mrf.mxu0 }
 0x5c3   :  { %981 = vst.msk [vmem:[#allocation2 + $0x8] sm:$0xff] %vm189_vm2, %v947_v19  ;;  %v942_v21 = vadd.f32 %v2662_v17, %v941_v20 }
 0x5c4   :  { %v2208_v22 = vpop.f32.mrf.mxu0 }
 0x5c5   :  { %980 = vst.msk [vmem:[#allocation2] sm:$0xff] %vm189_vm2, %v942_v21  ;;  %v957_v23 = vadd.f32 %v2208_v22, %v2662_v17 }
 0x5c6   :  { %v951_v24 = vpop.f32.mrf.mxu0 }
 0x5c7   :  { %983 = vst.msk [vmem:[#allocation2 + $0x18] sm:$0xff] %vm189_vm2, %v957_v23  ;;  %v952_v25 = vadd.f32 %v2662_v17, %v951_v24 }
 0x5c8   :  { %v2358_v26 = vpop.eup %2357  ;;  %v2211_v27 = vpop.f32.mrf.mxu0 }
 0x5c9   :  { %748 = vst.msk [vmem:[#allocation3 + $0x30] sm:$0xff] %vm189_vm2, %v2358_v26  ;;  %982 = vst.msk [vmem:[#allocation2 + $0x10] sm:$0xff] %vm189_vm2, %v952_v25  ;;  %v967_v28 = vadd.f32 %v2211_v27, %v2662_v17  ;;  %2193 = vmatmul.mubr.msk.f32.vlgmr.msra.gmra.mxu1 %vm189_vm2, %v2358_v26  ;;  %v2793_v25 = vld [vmem:[%s2862_s8] ss:$0 sm:$0xff] }
 0x5ca   :  { %v961_v29 = vpop.f32.mrf.mxu0  ;;  %2216 = vmatpush3.msra.mxu1 %v2634_v9  ;;  %2223 = vmatprep.mubr.msk.f32.mxu1 %vm2378_vm1, %v2377_v3  ;;  %v1062_v43 = vld [vmem:[#allocation2 + $0x8] sm:$0xff] }
 0x5cb   :  { %985 = vst.msk [vmem:[#allocation2 + $0x28] sm:$0xff] %vm189_vm2, %v967_v28  ;;  %v962_v30 = vadd.f32 %v2662_v17, %v961_v29  ;;  %2217 = vmatprep.subr.mxu1 %v2377_v3 }
 0x5cc   :  { %2218 = vmatpush3.msra.mxu1 %v2640_v10  ;;  %v988_v36 = vld [vmem:[#allocation2] sm:$0xff] }
 0x5cd   :  { %984 = vst.msk [vmem:[#allocation2 + $0x20] sm:$0xff] %vm189_vm2, %v962_v30  ;;  %2219 = vmatprep.subr.mxu1 %v2377_v3 }
 0x5ce   :  { %2220 = vmatpush3.msra.mxu1 %v2647_v11  ;;  %v1216_v57 = vld [vmem:[#allocation2 + $0x18] sm:$0xff] }
 0x5cf   :  { %2221 = vmatprep.subr.mxu1 %v2377_v3 }
 0x5d0   :  { %2222 = vmatpush3.msra.mxu1 %v2654_v12  ;;  %v843_v31 = vld [vmem:[#allocation3 + $0x30] sm:$0xff] }
 0x5d1   :  { %2224 = vmatmul.mubr.f32.vlgmr.msra.gmra.mxu1 %v2377_v3  ;;  %2212 = vmatprep.mubr.msk.f32.mxu0 %vm189_vm2, %v843_v31  ;;  %v1139_v52 = vld [vmem:[#allocation2 + $0x10] sm:$0xff] }
 0x5d2   :  { %2226 = vmatprep.subr.mxu1 %v2377_v3  ;;  %2234 = vmatprep.mubr.msk.f32.mxu1 %vm2378_vm1, %v2377_v3  ;;  %v1370_v5 = vld [vmem:[#allocation2 + $0x28] sm:$0xff]  ;;  %v1759_v31 = vld [vmem:[%s2861_s9 + $0x10] sm:$0xff] }
 0x5d3   :  { %2227 = vmatpush3.msra.mxu1 %v2634_v9 }
 0x5d4   :  { %2228 = vmatprep.subr.mxu1 %v2377_v3  ;;  %v1293_v62 = vld [vmem:[#allocation2 + $0x20] sm:$0xff] }
 0x5d5   :  { %2229 = vmatpush3.msra.mxu1 %v2640_v10 }
 0x5d6   :  { %2230 = vmatprep.subr.mxu1 %v2377_v3 }
 0x5d7   :  { %2231 = vmatpush3.msra.mxu1 %v2647_v11 }
 0x5d8   :  { %2232 = vmatprep.subr.mxu1 %v2377_v3 }
 0x5d9   :  { %2233 = vmatpush3.msra.mxu1 %v2654_v12 }
 0x5da   :  { %2248 = vmatprep.subr.mxu1 %v2377_v3 }
 0x689   :  { %v820_v33 = vpop.f32.mrf.mxu1 }
 0x68a   :  { %v824_v34 = vadd.f32 %v820_v33, %v750_v32  ;;  %v1758_v33 = vld [vmem:[%s2861_s9 + $0x8] sm:$0xff] }
 0x68b   :  { %v2194_v35 = vpop.f32.mrf.mxu1 }
 0x68c   :  { %2359 = vtanh.f32 %v824_v34 }
 0x691   :  { %v1055_v37 = vpop.f32.mrf.mxu1 }
 0x692   :  { %v1059_v38 = vadd.f32 %v1055_v37, %v988_v36  ;;  %v1757_v36 = vld [vmem:[%s2861_s9] sm:$0xff] }
 0x693   :  { %v2225_v39 = vpop.f32.mrf.mxu1 }
 0x694   :  { %2361 = vtanh.f32 %v1059_v38 }
 0x699   :  { %v2360_v40 = vpop.eup %2359 }
 0x69a   :  { %827 = vst.msk [vmem:[#allocation3 + $0x38] sm:$0xff] %vm189_vm2, %v2360_v40 }
 0x6a1   :  { %v2362_v41 = vpop.eup %2361  ;;  %v844_v42 = vld [vmem:[#allocation3 + $0x38] sm:$0xff] }
 0x6a2   :  { %1061 = vst.msk [vmem:[#allocation3] sm:$0xff] %vm189_vm2, %v2362_v41  ;;  %2235 = vmatmul.mubr.msk.f32.vlgmr.msra.gmra.mxu1 %vm189_vm2, %v2362_v41  ;;  %2213 = vmatmul.mubr.msk.f32.gmra.mxu0 %vm189_vm2, %v844_v42 }
 0x6a3   :  { %2245 = vmatprep.mubr.msk.f32.mxu0 %vm2378_vm1, %v2377_v3  ;;  %2249 = vmatpush3.msra.mxu1 %v2634_v9 }
 0x6a4   :  { %2250 = vmatprep.subr.mxu1 %v2377_v3  ;;  %2256 = vmatprep.mubr.msk.f32.mxu1 %vm2378_vm1, %v2377_v3 }
 0x6a5   :  { %2251 = vmatpush3.msra.mxu1 %v2640_v10 }
 0x6a6   :  { %2252 = vmatprep.subr.mxu1 %v2377_v3 }
 0x6a7   :  { %2253 = vmatpush3.msra.mxu1 %v2647_v11 }
 0x6a8   :  { %2254 = vmatprep.subr.mxu1 %v2377_v3 }
 0x6a9   :  { %2255 = vmatpush3.msra.mxu1 %v2654_v12 }
 0x6aa   :  { %2270 = vmatprep.subr.mxu1 %v2377_v3 }
 0x762   :  { %v1132_v44 = vpop.f32.mrf.mxu1  ;;  %v2214_v45 = vpop.f32.mrf.mxu0 }
 0x763   :  { %v1136_v46 = vadd.f32 %v1132_v44, %v1062_v43  ;;  %v977_v47 = vadd.f32 %v2214_v45, %v2662_v17 }
 0x764   :  { %v2236_v48 = vpop.f32.mrf.mxu1  ;;  %v971_v49 = vpop.f32.mrf.mxu0 }
 0x765   :  { %2363 = vtanh.f32 %v1136_v46  ;;  %987 = vst.msk [vmem:[#allocation2 + $0x38] sm:$0xff] %vm189_vm2, %v977_v47  ;;  %v972_v50 = vadd.f32 %v2662_v17, %v971_v49 }
 0x767   :  { %986 = vst.msk [vmem:[#allocation2 + $0x30] sm:$0xff] %vm189_vm2, %v972_v50 }
 0x76c   :  { %v1524_v47 = vld [vmem:[#allocation2 + $0x38] sm:$0xff] }
 0x76e   :  { %v1447_v19 = vld [vmem:[#allocation2 + $0x30] sm:$0xff] }
 0x772   :  { %v2364_v51 = vpop.eup %2363 }
 0x773   :  { %1138 = vst.msk [vmem:[#allocation3 + $0x8] sm:$0xff] %vm189_vm2, %v2364_v51  ;;  %2246 = vmatmul.mubr.msk.f32.vlgmr.msra.gmra.mxu0 %vm189_vm2, %v2364_v51  ;;  %v1955_v51 = vld [vmem:[%s2863_s10] ss:$0 sm:$0xff] }
 0x774   :  { %2260 = vmatpush3.msra.mxu0 %v2634_v9  ;;  %2267 = vmatprep.mubr.msk.f32.mxu0 %vm2378_vm1, %v2377_v3 }
 0x775   :  { %2261 = vmatprep.subr.mxu0 %v2377_v3 }
 0x776   :  { %2262 = vmatpush3.msra.mxu0 %v2640_v10 }
 0x777   :  { %2263 = vmatprep.subr.mxu0 %v2377_v3 }
 0x778   :  { %2264 = vmatpush3.msra.mxu0 %v2647_v11 }
 0x779   :  { %2265 = vmatprep.subr.mxu0 %v2377_v3 }
 0x77a   :  { %2266 = vmatpush3.msra.mxu0 %v2654_v12  ;;  %v1602_v13 = vld [vmem:[#allocation3 + $0x8] sm:$0xff] }
 0x77b   :  { %2281 = vmatprep.subr.mxu0 %v2377_v3 }
 0x833   :  { %v1209_v53 = vpop.f32.mrf.mxu0 }
 0x834   :  { %v1213_v54 = vadd.f32 %v1209_v53, %v1139_v52 }
 0x835   :  { %v2247_v55 = vpop.f32.mrf.mxu0 }
 0x836   :  { %2365 = vtanh.f32 %v1213_v54 }
 0x843   :  { %v2366_v56 = vpop.eup %2365 }
 0x844   :  { %1215 = vst.msk [vmem:[#allocation3 + $0x10] sm:$0xff] %vm189_vm2, %v2366_v56  ;;  %2257 = vmatmul.mubr.msk.f32.vlgmr.msra.gmra.mxu1 %vm189_vm2, %v2366_v56 }
 0x845   :  { %2271 = vmatpush3.msra.mxu1 %v2634_v9  ;;  %2278 = vmatprep.mubr.msk.f32.mxu1 %vm2378_vm1, %v2377_v3 }
 0x846   :  { %2272 = vmatprep.subr.mxu1 %v2377_v3 }
 0x847   :  { %2273 = vmatpush3.msra.mxu1 %v2640_v10 }
 0x848   :  { %2274 = vmatprep.subr.mxu1 %v2377_v3 }
 0x849   :  { %2275 = vmatpush3.msra.mxu1 %v2647_v11 }
 0x84a   :  { %2276 = vmatprep.subr.mxu1 %v2377_v3 }
 0x84b   :  { %2277 = vmatpush3.msra.mxu1 %v2654_v12  ;;  %v1603_v14 = vld [vmem:[#allocation3 + $0x10] sm:$0xff] }
 0x84c   :  { %2292 = vmatprep.subr.mxu1 %v2377_v3 }
 0x904   :  { %v1286_v58 = vpop.f32.mrf.mxu1 }
 0x905   :  { %v1290_v59 = vadd.f32 %v1286_v58, %v1216_v57 }
 0x906   :  { %v2258_v60 = vpop.f32.mrf.mxu1 }
 0x907   :  { %2367 = vtanh.f32 %v1290_v59 }
 0x914   :  { %v2368_v61 = vpop.eup %2367 }
 0x915   :  { %1292 = vst.msk [vmem:[#allocation3 + $0x18] sm:$0xff] %vm189_vm2, %v2368_v61  ;;  %2268 = vmatmul.mubr.msk.f32.vlgmr.msra.gmra.mxu0 %vm189_vm2, %v2368_v61 }
 0x916   :  { %2282 = vmatpush3.msra.mxu0 %v2634_v9  ;;  %2289 = vmatprep.mubr.msk.f32.mxu0 %vm2378_vm1, %v2377_v3 }
 0x917   :  { %2283 = vmatprep.subr.mxu0 %v2377_v3 }
 0x918   :  { %2284 = vmatpush3.msra.mxu0 %v2640_v10 }
 0x919   :  { %2285 = vmatprep.subr.mxu0 %v2377_v3 }
 0x91a   :  { %2286 = vmatpush3.msra.mxu0 %v2647_v11 }
 0x91b   :  { %2287 = vmatprep.subr.mxu0 %v2377_v3 }
 0x91c   :  { %2288 = vmatpush3.msra.mxu0 %v2654_v12  ;;  %v1604_v15 = vld [vmem:[#allocation3 + $0x18] sm:$0xff] }
 0x91d   :  { %2303 = vmatprep.subr.mxu0 %v1612_v4 }
 0x9d5   :  { %v1363_v63 = vpop.f32.mrf.mxu0 }
 0x9d6   :  { %v1367_v0 = vadd.f32 %v1363_v63, %v1293_v62 }
 0x9d7   :  { %v2269_v1 = vpop.f32.mrf.mxu0 }
 0x9d8   :  { %2369 = vtanh.f32 %v1367_v0 }
 0x9e5   :  { %v2370_v2 = vpop.eup %2369 }
 0x9e6   :  { %1369 = vst.msk [vmem:[#allocation3 + $0x20] sm:$0xff] %vm189_vm2, %v2370_v2  ;;  %2279 = vmatmul.mubr.msk.f32.vlgmr.msra.gmra.mxu1 %vm189_vm2, %v2370_v2 }
 0x9e7   :  { %2293 = vmatpush3.msra.mxu1 %v2634_v9  ;;  %2300 = vmatprep.mubr.msk.f32.mxu1 %vm2378_vm1, %v2377_v3 }
 0x9e8   :  { %2294 = vmatprep.subr.mxu1 %v2377_v3 }
 0x9e9   :  { %2295 = vmatpush3.msra.mxu1 %v2640_v10  ;;  %v1611_v10 = vld [vmem:[%s2860_s7 + $0x10] sm:$0xff] }
 0x9ea   :  { %2296 = vmatprep.subr.mxu1 %v2377_v3 }
 0x9eb   :  { %2297 = vmatpush3.msra.mxu1 %v2647_v11  ;;  %v1610_v11 = vld [vmem:[%s2860_s7 + $0x8] sm:$0xff] }
 0x9ec   :  { %2298 = vmatprep.subr.mxu1 %v2377_v3  ;;  %v1601_v3 = vld [vmem:[#allocation3] sm:$0xff] }
 0x9ed   :  { %2299 = vmatpush3.msra.mxu1 %v2654_v12  ;;  %v1609_v12 = vld [vmem:[%s2860_s7] sm:$0xff] }
 0x9ee   :  { %v1605_v16 = vld [vmem:[#allocation3 + $0x20] sm:$0xff]  ;;  %2323 = vmatprep.subr.msk.mxu1 %vm1793_vm3, %v1760_v18 }
 0xaa6   :  { %v1440_v6 = vpop.f32.mrf.mxu1 }
 0xaa7   :  { %v1444_v7 = vadd.f32 %v1440_v6, %v1370_v5 }
 0xaa8   :  { %v2280_v8 = vpop.f32.mrf.mxu1 }
 0xaa9   :  { %2371 = vtanh.f32 %v1444_v7 }
 0xab6   :  { %v2372_v9 = vpop.eup %2371 }
 0xab7   :  { %1446 = vst.msk [vmem:[#allocation3 + $0x28] sm:$0xff] %vm189_vm2, %v2372_v9  ;;  %2290 = vmatmul.mubr.msk.f32.vlgmr.msra.gmra.mxu0 %vm189_vm2, %v2372_v9 }
 0xab8   :  { %2304 = vmatpush3.msra.mxu0 %v1612_v4  ;;  %2311 = vmatprep.mubr.msk.f32.mxu0 %vm189_vm2, %v1601_v3 }
 0xab9   :  { %2305 = vmatprep.subr.mxu0 %v1611_v10 }
 0xaba   :  { %2306 = vmatpush3.msra.mxu0 %v1611_v10 }
 0xabb   :  { %2307 = vmatprep.subr.mxu0 %v1610_v11 }
 0xabc   :  { %2308 = vmatpush3.msra.mxu0 %v1610_v11 }
 0xabd   :  { %2309 = vmatprep.subr.mxu0 %v1609_v12 }
 0xabe   :  { %2310 = vmatpush3.msra.mxu0 %v1609_v12  ;;  %v1606_v17 = vld [vmem:[#allocation3 + $0x28] sm:$0xff] }
 0xabf   :  { %2312 = vmatmul.mubr.msk.f32.vlgmr.msra.gmra.mxu0 %vm189_vm2, %v1602_v13 }
 0xac0   :  { %2314 = vmatprep.mubr.msk.f32.mxu0 %vm189_vm2, %v1603_v14 }
 0xac3   :  { %2315 = vmatmul.mubr.msk.f32.gmra.mxu0 %vm189_vm2, %v1604_v15 }
 0xac4   :  { %2317 = vmatprep.mubr.msk.f32.mxu0 %vm189_vm2, %v1605_v16 }
 0xac7   :  { %2318 = vmatmul.mubr.msk.f32.gmra.mxu0 %vm189_vm2, %v1606_v17 }
 0xb77   :  { %v1517_v20 = vpop.f32.mrf.mxu0 }
 0xb78   :  { %v1521_v21 = vadd.f32 %v1517_v20, %v1447_v19 }
 0xb79   :  { %v2291_v22 = vpop.f32.mrf.mxu0 }
 0xb7a   :  { %2373 = vtanh.f32 %v1521_v21 }
 0xb7f   :  { %v2313_v23 = vpop.f32.mrf.mxu0 }
 0xb80   :  { %v1716_v34 = vadd.f32 %v2313_v23, %v2793_v25 }
 0xb81   :  { %v1710_v24 = vpop.f32.mrf.mxu0 }
 0xb82   :  { %v1711_v26 = vadd.f32 %v2793_v25, %v1710_v24  ;;  %v1750_v38 = vmax.f32 %v1716_v34, 0.0 }
 0xb83   :  { %v2316_v27 = vpop.f32.mrf.mxu0 }
 0xb84   :  { %v1749_v30 = vmax.f32 %v1711_v26, 0.0  ;;  %v1726_v39 = vadd.f32 %v2316_v27, %v2793_v25 }
 0xb85   :  { %v1720_v28 = vpop.f32.mrf.mxu0 }
 0xb86   :  { %v1721_v35 = vadd.f32 %v2793_v25, %v1720_v28  ;;  %v1752_v43 = vmax.f32 %v1726_v39, 0.0 }
 0xb87   :  { %v2374_v29 = vpop.eup %2373  ;;  %v2319_v32 = vpop.f32.mrf.mxu0 }
 0xb88   :  { %1523 = vst.msk [vmem:[#allocation3 + $0x30] sm:$0xff] %vm189_vm2, %v2374_v29  ;;  %2301 = vmatmul.mubr.msk.f32.vlgmr.msra.gmra.mxu1 %vm189_vm2, %v2374_v29  ;;  %v1751_v40 = vmax.f32 %v1721_v35, 0.0  ;;  %v1736_v44 = vadd.f32 %v2319_v32, %v2793_v25 }
 0xb89   :  { %2324 = vmatpush3.msk.msra.mxu1 %vm1793_vm3, %v1760_v18  ;;  %2331 = vmatprep.mubr.msk.f32.mxu1 %vm1768_vm4, %v1749_v30  ;;  %v1730_v37 = vpop.f32.mrf.mxu0 }
 0xb8a   :  { %2325 = vmatprep.subr.mxu1 %v1759_v31  ;;  %v1731_v41 = vadd.f32 %v2793_v25, %v1730_v37  ;;  %v1754_v46 = vmax.f32 %v1736_v44, 0.0 }
 0xb8b   :  { %2326 = vmatpush3.msra.mxu1 %v1759_v31 }
 0xb8c   :  { %2327 = vmatprep.subr.mxu1 %v1758_v33  ;;  %v1753_v45 = vmax.f32 %v1731_v41, 0.0 }
 0xb8d   :  { %2328 = vmatpush3.msra.mxu1 %v1758_v33 }
 0xb8e   :  { %2329 = vmatprep.subr.mxu1 %v1757_v36 }
 0xb8f   :  { %2330 = vmatpush3.msra.mxu1 %v1757_v36  ;;  %v1607_v42 = vld [vmem:[#allocation3 + $0x30] sm:$0xff] }
 0xb90   :  { %2332 = vmatmul.mubr.msk.f32.vlgmr.msra.gmra.mxu1 %vm1768_vm4, %v1750_v38  ;;  %2320 = vmatprep.mubr.msk.f32.mxu0 %vm189_vm2, %v1607_v42 }
 0xb91   :  { %2334 = vmatprep.mubr.msk.f32.mxu1 %vm1768_vm4, %v1751_v40 }
 0xb94   :  { %2335 = vmatmul.mubr.msk.f32.gmra.mxu1 %vm1768_vm4, %v1752_v43 }
 0xb95   :  { %2337 = vmatprep.mubr.msk.f32.mxu1 %vm1768_vm4, %v1753_v45 }
 0xb98   :  { %2338 = vmatmul.mubr.msk.f32.gmra.mxu1 %vm1768_vm4, %v1754_v46 }
 0xc48   :  { %v1594_v48 = vpop.f32.mrf.mxu1 }
 0xc49   :  { %v1598_v49 = vadd.f32 %v1594_v48, %v1524_v47 }
 0xc4a   :  { %v2302_v50 = vpop.f32.mrf.mxu1 }
 0xc4b   :  { %2375 = vtanh.f32 %v1598_v49 }
 0xc50   :  { %v2333_v52 = vpop.f32.mrf.mxu1 }
 0xc51   :  { %v1869_v53 = vadd.f32 %v2333_v52, %v1955_v51 }
 0xc52   :  { %v1863_v54 = vpop.f32.mrf.mxu1 }
 0xc53   :  { %1903 = vst [vmem:[%s2864_s11 + $0x8] sm:$0xff] %v1869_v53  ;;  %v1864_v55 = vadd.f32 %v1955_v51, %v1863_v54 }
 0xc54   :  { %v2336_v56 = vpop.f32.mrf.mxu1 }
 0xc55   :  { %1902 = vst [vmem:[%s2864_s11] sm:$0xff] %v1864_v55  ;;  %v1879_v57 = vadd.f32 %v2336_v56, %v1955_v51 }
 0xc56   :  { %v1873_v58 = vpop.f32.mrf.mxu1 }
 0xc57   :  { %1905 = vst [vmem:[%s2864_s11 + $0x18] sm:$0xff] %v1879_v57  ;;  %v1874_v59 = vadd.f32 %v1955_v51, %v1873_v58 }
 0xc58   :  { %v2376_v60 = vpop.eup %2375  ;;  %v2339_v61 = vpop.f32.mrf.mxu1 }
 0xc59   :  { %1600 = vst.msk [vmem:[#allocation3 + $0x38] sm:$0xff] %vm189_vm2, %v2376_v60  ;;  %1904 = vst [vmem:[%s2864_s11 + $0x10] sm:$0xff] %v1874_v59  ;;  %v1889_v62 = vadd.f32 %v2339_v61, %v1955_v51 }
 0xc5a   :  { %v1883_v63 = vpop.f32.mrf.mxu1 }
 0xc5b   :  { %1907 = vst [vmem:[%s2864_s11 + $0x28] sm:$0xff] %v1889_v62  ;;  %v1884_v0 = vadd.f32 %v1955_v51, %v1883_v63 }
 0xc5d   :  { %1906 = vst [vmem:[%s2864_s11 + $0x20] sm:$0xff] %v1884_v0 }
 0xc60   :  { %v1608_v1 = vld [vmem:[#allocation3 + $0x38] sm:$0xff] }
 0xc61   :  { %2321 = vmatmul.mubr.msk.f32.gmra.mxu0 %vm189_vm2, %v1608_v1 }
 0xd21   :  { %v2322_v2 = vpop.f32.mrf.mxu0 }
 0xd22   :  { %v1746_v4 = vadd.f32 %v2322_v2, %v2793_v25 }
 0xd23   :  { %v1740_v5 = vpop.f32.mrf.mxu0 }
 0xd24   :  { %v1741_v6 = vadd.f32 %v2793_v25, %v1740_v5  ;;  %v1756_v8 = vmax.f32 %v1746_v4, 0.0 }
 0xd26   :  { %v1755_v7 = vmax.f32 %v1741_v6, 0.0 }
 0xd28   :  { %2340 = vmatprep.mubr.msk.f32.mxu1 %vm1768_vm4, %v1755_v7 }
 0xd29   :  { %2341 = vmatmul.mubr.msk.f32.gmra.mxu1 %vm1768_vm4, %v1756_v8 }
 0xde9   :  { %v2342_v9 = vpop.f32.mrf.mxu1 }
 0xdea   :  { %v1899_v10 = vadd.f32 %v2342_v9, %v1955_v51 }
 0xdeb   :  { %v1893_v3 = vpop.f32.mrf.mxu1 }
 0xdec   :  { %1909 = vst [vmem:[%s2864_s11 + $0x38] sm:$0xff] %v1899_v10  ;;  %v1894_v11 = vadd.f32 %v1955_v51, %v1893_v3 }
 0xdee   :  { %1908 = vst [vmem:[%s2864_s11 + $0x30] sm:$0xff] %v1894_v11 }

</bundles_post_ra>
